<compile_context>
chip_gen: v6e
topology: v6e:2x2x1
jax: 0.10.0
libtpu: 0.0.40
codegen_flags: <defaults>
</compile_context>

<pallas_src>
import functools

import jax
import jax.numpy as jnp
from jax.experimental import pallas as pl
from jax.experimental.pallas import tpu as pltpu


# --- activation table standing in for TORCH_FUN -----------------------------
JNP_FUN = {
    "tanh": jnp.tanh,
    "relu": lambda v: jnp.maximum(v, 0.0),
    "sigmoid": jax.nn.sigmoid,
    "identity": lambda v: v,
}

_LANE = 128        # TPU lane width (last dim of every vreg)
_STRIP_ROWS = 64   # rows per inner MAC strip (64x128 f32 acc = 8 vregs)


def _node_kernel(p_ref, x_ref, o_ref, *, fun, C, strip):
    """One grid step: out[tile] = fun(sum_c params[c] * X[c, tile])."""
    # p_ref: (C,)                f32 scalars in SMEM (scalar prefetch)
    # x_ref: (C, rows_tile, 128) feature tile of X, original dtype
    # o_ref: (rows_tile, 128)    sublane/lane-dense output tile
    rows_tile = o_ref.shape[0]
    n_full = rows_tile // strip
    rem = rows_tile - n_full * strip

    def mac_store(r0, nrows):
        # Unrolled scalar-x-vector MAC over the (small, static) channel dim.
        acc = p_ref[0] * x_ref[0, pl.ds(r0, nrows), :].astype(jnp.float32)
        for c in range(1, C):
            acc = acc + p_ref[c] * x_ref[c, pl.ds(r0, nrows), :].astype(jnp.float32)
        o_ref[pl.ds(r0, nrows), :] = fun(acc).astype(o_ref.dtype)

    if n_full > 0:
        def body(s, carry):
            r0 = pl.multiple_of(s * strip, strip)
            mac_store(r0, strip)
            return carry

        jax.lax.fori_loop(0, n_full, body, 0)

    if rem > 0:  # static tail when the tile is not a multiple of the strip
        mac_store(n_full * strip, rem)


def torch_node_forward(params, X, *, fun_name="tanh",
                       target_x_bytes_per_step=8 << 20):
    """params: (C,), X: (C, N) -> (N,)  ==  fun(params @ X)."""
    C, N = X.shape
    assert params.shape == (C,)
    fun = JNP_FUN[fun_name]

    out_dtype = jnp.result_type(params.dtype, X.dtype)
    p_smem = params.astype(jnp.float32)  # 32-bit scalars for SMEM

    # ---- lane-dense view: X as (C, rows, 128) -------------------------------
    rows = pl.cdiv(N, _LANE)
    pad_cols = rows * _LANE - N
    if pad_cols:
        # Only the <=127-column pad required for the reshape; no full-copy
        # padding to rows_tile granularity (partial blocks are masked).
        X = jnp.pad(X, ((0, 0), (0, pad_cols)))
    x3 = X.reshape(C, rows, _LANE)

    x_itemsize = jnp.dtype(X.dtype).itemsize
    out_itemsize = jnp.dtype(out_dtype).itemsize
    x_bytes_per_row = C * _LANE * x_itemsize
    out_bytes_per_row = _LANE * out_itemsize

    # ---- rows_tile: sized from an HBM-traffic target, clamped by VMEM -------
    # ~8 MiB of X per grid step keeps the ~0.35us/step overhead <5% of the
    # HBM drain time on v5e/v6e/v7x.
    rows_tile = max(1, target_x_bytes_per_step // x_bytes_per_row)
    # Keep >=2 grid steps when there is enough work so v7x's two TensorCores
    # both get a share of the "parallel" grid axis.
    if rows > 2 * _STRIP_ROWS:
        rows_tile = min(rows_tile, pl.cdiv(rows, 2))
    # VMEM budget: double-buffered input + output tiles must fit (v7x: 64 MiB
    # physical per TC).
    vmem_budget = 40 << 20
    rows_tile = min(
        rows_tile,
        max(1, vmem_budget // (2 * (x_bytes_per_row + out_bytes_per_row))),
        rows,
    )

    # ---- alignment (only matters when the row axis is actually tiled) -------
    sublane_align = 8 * max(1, 4 // x_itemsize)  # 8 f32, 16 bf16, 32 int8/fp8
    if rows_tile < rows:
        if rows_tile >= _STRIP_ROWS:
            rows_tile = (rows_tile // _STRIP_ROWS) * _STRIP_ROWS
        else:
            rows_tile = max(sublane_align,
                            (rows_tile // sublane_align) * sublane_align)
    strip = min(_STRIP_ROWS, rows_tile)

    grid_steps = pl.cdiv(rows, rows_tile)

    # Explicit VMEM limit: large tiles overflow the scoped defaults
    # (16 MiB v5e / 32 MiB v6e,v7x); cap at 48 MiB to stay inside v7x's
    # 64 MiB physical VMEM.
    needed = 2 * rows_tile * (x_bytes_per_row + out_bytes_per_row)
    vmem_limit = int(min(48 << 20, max(32 << 20, needed + (8 << 20))))

    out = pl.pallas_call(
        functools.partial(_node_kernel, fun=fun, C=C, strip=strip),
        out_shape=jax.ShapeDtypeStruct((rows, _LANE), out_dtype),
        grid_spec=pltpu.PrefetchScalarGridSpec(
            num_scalar_prefetch=1,  # params -> SMEM before the grid runs
            grid=(grid_steps,),
            in_specs=[
                # X feature tile; index_map gets the prefetch ref positionally.
                pl.BlockSpec((C, rows_tile, _LANE), lambda j, p: (0, j, 0)),
            ],
            out_specs=pl.BlockSpec((rows_tile, _LANE), lambda j, p: (j, 0)),
        ),
        compiler_params=pltpu.CompilerParams(
            dimension_semantics=("parallel",),  # v7x: shard rows over 2 TCs
            vmem_limit_bytes=vmem_limit,
        ),
        cost_estimate=pl.CostEstimate(
            flops=2 * C * N,
            transcendentals=N if fun_name in ("tanh", "sigmoid") else 0,
            bytes_accessed=C * N * x_itemsize + N * out_itemsize + 4 * C,
        ),
    )(p_smem, x3)

    return out.reshape(rows * _LANE)[:N]


if __name__ == "__main__":
    key = jax.random.PRNGKey(0)
    k1, k2 = jax.random.split(key)

    # Node with 4 children; weight * ones(len(children)) init (weight = 0.5).
    num_children = 4
    weight = 0.5
    params = weight * jnp.ones((num_children,), dtype=jnp.float32)

    # X stacks the 4 children outputs, each of length 256.
    N = 256
    X = jax.random.normal(k2, (num_children, N), dtype=jnp.float32)

    out = torch_node_forward(params, X, fun_name="tanh")
    out = jax.block_until_ready(out)

    ref = jnp.tanh(params @ X)
    assert out.shape == (N,)
    assert jnp.allclose(out, ref, atol=1e-5, rtol=1e-5)

    # Secondary check: multi-step grid with a partial last block (forces the
    # masked-block path by shrinking the per-step traffic target).
    N2 = 2560  # rows = 20, rows_tile = 8 -> 3 grid steps, last one partial
    X2 = jax.random.normal(k1, (num_children, N2), dtype=jnp.float32)
    out2 = torch_node_forward(params, X2, fun_name="tanh",
                              target_x_bytes_per_step=8 * num_children * 128 * 4)
    out2 = jax.block_until_ready(out2)
    ref2 = jnp.tanh(params @ X2)
    assert out2.shape == (N2,)
    assert jnp.allclose(out2, ref2, atol=1e-5, rtol=1e-5)

    print("KERNEL_OK")
</pallas_src>

<mosaic_0001>
module attributes {stable_mosaic.version = 11 : i64} {
  func.func @_node_kernel(%arg0: i32, %arg1: memref<4xf32, #tpu.memory_space<smem>>, %arg2: memref<4x2x128xf32, #tpu.memory_space<vmem>>, %arg3: memref<2x128xf32, #tpu.memory_space<vmem>>) attributes {dimension_semantics = [#tpu.dimension_semantics<parallel>], iteration_bounds = array<i64: 1>, scalar_prefetch = 1 : i64, scratch_operands = 0 : i64, tpu.core_type = #tpu.core_type<tc>, window_params = [{transform_indices = @transform_0, window_bounds = array<i64: 4, 2, 128>}, {transform_indices = @transform_1, window_bounds = array<i64: 2, 128>}]} {
    %c0_i32 = arith.constant 0 : i32
    %c2_i32 = arith.constant 2 : i32
    %0 = arith.muli %c0_i32, %c2_i32 : i32
    %1 = tpu.assume_multiple %0, 2 : i32
    %c0 = arith.constant 0 : index
    %2 = memref.load %arg1[%c0] : memref<4xf32, #tpu.memory_space<smem>>
    %c0_0 = arith.constant 0 : index
    %3 = arith.index_cast %1 : i32 to index
    %c0_1 = arith.constant 0 : index
    %4 = vector.load %arg2[%c0_0, %3, %c0_1] : memref<4x2x128xf32, #tpu.memory_space<vmem>>, vector<1x2x128xf32>
    %5 = vector.shape_cast %4 : vector<1x2x128xf32> to vector<2x128xf32>
    %6 = vector.broadcast %2 : f32 to vector<2x128xf32>
    %7 = arith.mulf %6, %5 : vector<2x128xf32>
    %c1 = arith.constant 1 : index
    %8 = memref.load %arg1[%c1] : memref<4xf32, #tpu.memory_space<smem>>
    %c1_2 = arith.constant 1 : index
    %9 = arith.index_cast %1 : i32 to index
    %c0_3 = arith.constant 0 : index
    %10 = vector.load %arg2[%c1_2, %9, %c0_3] : memref<4x2x128xf32, #tpu.memory_space<vmem>>, vector<1x2x128xf32>
    %11 = vector.shape_cast %10 : vector<1x2x128xf32> to vector<2x128xf32>
    %12 = vector.broadcast %8 : f32 to vector<2x128xf32>
    %13 = arith.mulf %12, %11 : vector<2x128xf32>
    %14 = arith.addf %7, %13 : vector<2x128xf32>
    %c2 = arith.constant 2 : index
    %15 = memref.load %arg1[%c2] : memref<4xf32, #tpu.memory_space<smem>>
    %c2_4 = arith.constant 2 : index
    %16 = arith.index_cast %1 : i32 to index
    %c0_5 = arith.constant 0 : index
    %17 = vector.load %arg2[%c2_4, %16, %c0_5] : memref<4x2x128xf32, #tpu.memory_space<vmem>>, vector<1x2x128xf32>
    %18 = vector.shape_cast %17 : vector<1x2x128xf32> to vector<2x128xf32>
    %19 = vector.broadcast %15 : f32 to vector<2x128xf32>
    %20 = arith.mulf %19, %18 : vector<2x128xf32>
    %21 = arith.addf %14, %20 : vector<2x128xf32>
    %c3 = arith.constant 3 : index
    %22 = memref.load %arg1[%c3] : memref<4xf32, #tpu.memory_space<smem>>
    %c3_6 = arith.constant 3 : index
    %23 = arith.index_cast %1 : i32 to index
    %c0_7 = arith.constant 0 : index
    %24 = vector.load %arg2[%c3_6, %23, %c0_7] : memref<4x2x128xf32, #tpu.memory_space<vmem>>, vector<1x2x128xf32>
    %25 = vector.shape_cast %24 : vector<1x2x128xf32> to vector<2x128xf32>
    %26 = vector.broadcast %22 : f32 to vector<2x128xf32>
    %27 = arith.mulf %26, %25 : vector<2x128xf32>
    %28 = arith.addf %21, %27 : vector<2x128xf32>
    %29 = math.tanh %28 : vector<2x128xf32>
    %30 = arith.index_cast %1 : i32 to index
    %c0_8 = arith.constant 0 : index
    %31 = vector.load %arg3[%30, %c0_8] : memref<2x128xf32, #tpu.memory_space<vmem>>, vector<2x128xf32>
    tpu.vector_store %arg3[%30, %c0_8], %29 {strides = array<i32>} : memref<2x128xf32, #tpu.memory_space<vmem>>, vector<2x128xf32>,
    %c1_i32 = arith.constant 1 : i32
    return
  }
  func.func @transform_0(%arg0: i32, %arg1: memref<4xf32, #tpu.memory_space<smem>>) -> (i32, i32, i32) {
    %c0_i32 = arith.constant 0 : i32
    %c0_i32_0 = arith.constant 0 : i32
    %c0_i32_1 = arith.constant 0 : i32
    return %c0_i32, %arg0, %c0_i32_0 : i32, i32, i32
  }
  func.func @transform_1(%arg0: i32, %arg1: memref<4xf32, #tpu.memory_space<smem>>) -> (i32, i32) {
    %c0_i32 = arith.constant 0 : i32
    %c0_i32_0 = arith.constant 0 : i32
    return %arg0, %c0_i32 : i32, i32
  }
}

</mosaic_0001>

<bundles_post_ra>
// kernel: tpu_custom_call.1
= control target key start
LH: loop header
LB: loop body
LE: loop exit
PB: predicated region body
PF: predicated region fallthrough
CT: control target
= control target key end

     0   :  { %s137_s9 = smov [#allocation3]   ;;  %s166_s0 = inlined_call_operand.hbm [shape: f32[4], index: 0, kind: input, shape index: {}]   ;;  %s167_s1 = inlined_call_operand.hbm [shape: f32[4,2,128], index: 1, kind: input, shape index: {}]   ;;  %s168_s2 = inlined_call_operand.hbm [shape: f32[2,128], index: 2, kind: output, shape index: {}]  }
   0x1   :  { %8 = dma.hbm_to_smem %s166_s0, 16, %s137_s9, [#allocation2] }
   0x2   :  { %131 = dma.done.wait [#allocation2], 16 }
   0x3   :  { %132 = vsyncadd [#allocation2], 4294967280 }
   0x4   :  { %10 = sfence }
   0x5   :  { %11 = vsyncpa [#allocation5], 0 }
   0x6   :  { %12 = vsyncpa [#allocation6], 0  ;;  %s138_s12 = smov [#allocation4]  }
   0x7   :  { %s18_s13 = sshll.u32 %s138_s12, 4  ;;  %s19_s13 = int_to_ptr.vmem [resolvable:$true] %s18_s13 }
   0x8   :  { %s99_s14 = scalar_lea.vmem %s19_s13, 128  ;;  %p104_p1 = scmp.lt.s32.totalorder %s19_s13, %s19_s13 }
   0x9   :  { %p100_p0 = scmp.ne.s32.totalorder %s19_s13, %s99_s14  ;;  %p105_p2 = scmp.lt.s32.totalorder %s99_s14, %s99_s14 }
   0xb   :  { %p106_p3 = por %p105_p2, %p104_p1 }
   0xd   :  { %p107_p4 = pnand %p106_p3, %p100_p0 }
   0xf   :  { %110 = shalt.err (!%p107_p4)
}
  0x10   :  { %s139_s15 = smov 32   ;;  %s140_s16 = smov 2  }
  0x11   :  { %24 = dma.hbm_to_vmem [thread:$0]  %s167_s1, 128, %s19_s13, [#allocation5], %s139_s15, %s139_s15, %s140_s16  }
  0x12   :  { %133 = dma.done.wait [#allocation5], 128  }
  0x13   :  { %134 = vsyncadd [#allocation5], 4294967168  ;;  %s28_s0 = sld [smem:[#allocation3]]  ;;  %v29_v0 = vld [vmem:[#allocation4] sm:$0x3]  ;;  %s141_s1 = smov [#allocation7]  }
  0x14   :  { %s73_s19 = sld [smem:[#allocation3 + $0x1]]  ;;  %v35_v2 = vld [vmem:[#allocation4 + $0x2] sm:$0x3]  ;;  %v42_v3 = vld [vmem:[#allocation4 + $0x4] sm:$0x3]  ;;  %s61_s22 = sshll.u32 %s141_s1, 4  ;;  %s62_s22 = int_to_ptr.vmem [resolvable:$true] %s61_s22 }
  0x15   :  { %s74_s20 = sld [smem:[#allocation3 + $0x2]]  ;;  %v49_v6 = vld [vmem:[#allocation4 + $0x6] sm:$0x3]  ;;  %s111_s23 = scalar_lea.vmem %s62_s22, 32 }
  0x16   :  { %s75_s21 = sld [smem:[#allocation3 + $0x3]]  ;;  %p112_p5 = scmp.ne.s32.totalorder %s62_s22, %s111_s23 }
  0x17   :  { %p116_p6 = scmp.lt.s32.totalorder %s62_s22, %s62_s22  ;;  %p117_p7 = scmp.lt.s32.totalorder %s111_s23, %s111_s23 }
  0x19   :  { %v30_v1 = vstv %s28_s0  ;;  %p118_p8 = por %p117_p7, %p116_p6 }
  0x1a   :  { %v31_v4 = vmul.f32 %v30_v1, %v29_v0  ;;  %v36_v5 = vstv %s73_s19 }
  0x1b   :  { %v37_v7 = vmul.f32 %v36_v5, %v35_v2  ;;  %v43_v8 = vstv %s74_s20  ;;  %p119_p9 = pnand %p118_p8, %p112_p5 }
  0x1c   :  { %v44_v9 = vmul.f32 %v43_v8, %v42_v3  ;;  %v50_v10 = vstv %s75_s21 }
  0x1d   :  { %v38_v11 = vadd.f32 %v37_v7, %v31_v4  ;;  %v51_v12 = vmul.f32 %v50_v10, %v49_v6 }
  0x1f   :  { %v45_v13 = vadd.f32 %v44_v9, %v38_v11 }
  0x21   :  { %v52_v14 = vadd.f32 %v51_v12, %v45_v13 }
  0x23   :  { %81 = vtanh.f32 %v52_v14 }
  0x30   :  { %v82_v15 = vpop.eup %81 }
  0x31   :  { %54 = vst [vmem:[#allocation7] sm:$0x3] %v82_v15 }
  0x32   :  { %122 = shalt.err (!%p119_p9)
}
  0x33   :  { %64 = dma.vmem_to_hbm [thread:$0]  %s62_s22, 32, %s168_s2, [#allocation6]  }
  0x34   :  { %135 = dma.done.wait [#allocation6], 32  }
  0x35   :  { %136 = vsyncadd [#allocation6], 4294967264 }
  0x36   :  { %68 = vsyncpa [#allocation5], 1 }
  0x37   :  { %69 = vsyncpa [#allocation6], 1 }

</bundles_post_ra>
